<compile_context>
chip_gen: v5e
topology: v5e:2x2
jax: 0.10.0
libtpu: 0.0.40
codegen_flags: <defaults>
</compile_context>

<pallas_src>
import jax
import jax.numpy as jnp
import numpy as np
from jax import lax
from jax.experimental import pallas as pl
from jax.experimental.pallas import tpu as pltpu


# 3x3 tap order: t = (oh + 1) * 3 + (ow + 1)  ==  kh * 3 + kw
_TAPS = tuple((oh, ow) for oh in (-1, 0, 1) for ow in (-1, 0, 1))


def _make_resmae_kernel(H, W, C):
    HW = H * W

    def kernel(x_ref, mask_ref, w_ref, b_ref, g_ref, be_ref, a_ref,
               o_ref, act_ref):
        # grid = (N, depth); depth is the inner "arbitrary" axis and the
        # activation is carried across it in the VMEM scratch `act_ref` (C, HW).
        d = pl.program_id(1)
        ndepth = pl.num_programs(1)

        @pl.when(d == 0)
        def _():
            # TODO(synk): nn.Dropout2d(p) training-mode stochastic channel
            # masking is implemented as the eval-mode identity here.
            act_ref[...] = x_ref[0]

        h0 = act_ref[...]                       # (C, HW) current activation
        w_d = w_ref[d]                          # (2, C, 9C) conv weight slabs
        b_d = b_ref[d]                          # (2, C, 1)  conv biases
        g_d = g_ref[d]                          # (2, C, 1)  InstanceNorm weight
        be_d = be_ref[d]                        # (2, C, 1)  InstanceNorm bias

        h = h0
        for su in range(2):                     # two Convolution + ADN('AN') subunits
            # ---- Conv3x3 ("same" zero padding) as ONE fused im2col matmul. --
            # X_col[t*C + ci, p] = h[ci, p + oh*W + ow]   (0 outside the image)
            cols = []
            for t, (oh, ow) in enumerate(_TAPS):
                shift = oh * W + ow
                if shift == 0:
                    cols.append(h)
                    continue
                s = shift % HW
                # explicit lane rotation: shifted[:, p] = h[:, (p + shift) % HW]
                # (== jnp.roll(h, -shift, axis=1)); wrapped boundary values are
                # zeroed by the precomputed 0/1 tap mask.
                shifted = jnp.concatenate([h[:, s:], h[:, :s]], axis=1)
                cols.append(shifted * mask_ref[t])            # (C, HW)
            x_col = jnp.concatenate(cols, axis=0)             # (9C, HW)

            z = jnp.dot(w_d[su], x_col,
                        preferred_element_type=jnp.float32)   # single MXU push
            z = z + b_d[su]                                   # (C, HW)

            # ---- PReLU ('A'), scalar weight (num_parameters=1). -------------
            alpha = a_ref[d, su]
            z = jnp.where(z >= 0.0, z, alpha * z)

            # ---- InstanceNorm2d(affine=True) ('N'); one-pass stats in f32. --
            mean = jnp.mean(z, axis=1, keepdims=True)         # (C, 1)
            mean_sq = jnp.mean(z * z, axis=1, keepdims=True)
            var = mean_sq - mean * mean
            z = (z - mean) * lax.rsqrt(var + 1e-5)
            h = z * g_d[su] + be_d[su]

        act_ref[...] = h0 + h                   # ResidualUnit identity skip

        @pl.when(d == ndepth - 1)
        def _():
            o_ref[0] = x_ref[0] + act_ref[...]  # outer residual: x + x_out

    return kernel


def _tap_masks(H, W):
    """0/1 validity masks (one per 3x3 tap) for 'same' zero padding, flattened."""
    masks = np.ones((9, 1, H * W), np.float32)
    for t, (oh, ow) in enumerate(_TAPS):
        m = np.ones((H, W), np.float32)
        if oh == -1:
            m[0, :] = 0.0
        elif oh == 1:
            m[H - 1, :] = 0.0
        if ow == -1:
            m[:, 0] = 0.0
        elif ow == 1:
            m[:, W - 1] = 0.0
        masks[t, 0, :] = m.reshape(-1)
    return jnp.asarray(masks)


def resmae_forward(x_nchw, params):
    """ResMAE forward (on=True, residual=True). x_nchw: (N, C, H, W) float32."""
    w, b, g, be, a = params                    # w: (depth, 2, Cout, Cin, 3, 3)
    depth = w.shape[0]
    N, C, H, W = x_nchw.shape
    HW = H * W
    assert HW % 128 == 0, "flattened spatial size must be a multiple of 128 (lane-dense)"

    # NCHW -> (N, C, H*W): pure reshape (no transpose); lane dim = H*W.
    x = x_nchw.reshape(N, C, HW).astype(jnp.float32)

    # (depth,2,Cout,Cin,kh,kw) -> (depth,2,Cout,(kh*3+kw)*Cin + ci) weight slab.
    w_slab = jnp.transpose(w, (0, 1, 2, 4, 5, 3)).reshape(depth, 2, C, 9 * C)
    w_slab = w_slab.astype(jnp.float32)
    b_col = b.reshape(depth, 2, C, 1).astype(jnp.float32)
    g_col = g.reshape(depth, 2, C, 1).astype(jnp.float32)
    be_col = be.reshape(depth, 2, C, 1).astype(jnp.float32)
    a_smem = a.astype(jnp.float32)
    masks = _tap_masks(H, W)

    out = pl.pallas_call(
        _make_resmae_kernel(H, W, C),
        out_shape=jax.ShapeDtypeStruct((N, C, HW), jnp.float32),
        grid_spec=pltpu.PrefetchScalarGridSpec(
            num_scalar_prefetch=0,
            grid=(N, depth),
            in_specs=[
                # activation image: one block per n, resident across depth
                pl.BlockSpec((1, C, HW), lambda n, d: (n, 0, 0)),
                # everything below: full-array blocks, constant index map
                # -> DMA'd into VMEM exactly once for the whole grid.
                pl.BlockSpec((9, 1, HW), lambda n, d: (0, 0, 0)),              # tap masks
                pl.BlockSpec((depth, 2, C, 9 * C), lambda n, d: (0, 0, 0, 0)),  # conv W
                pl.BlockSpec((depth, 2, C, 1), lambda n, d: (0, 0, 0, 0)),      # conv b
                pl.BlockSpec((depth, 2, C, 1), lambda n, d: (0, 0, 0, 0)),      # IN gamma
                pl.BlockSpec((depth, 2, C, 1), lambda n, d: (0, 0, 0, 0)),      # IN beta
                pl.BlockSpec(memory_space=pltpu.MemorySpace.SMEM),              # PReLU a
            ],
            out_specs=pl.BlockSpec((1, C, HW), lambda n, d: (n, 0, 0)),
            scratch_shapes=[pltpu.VMEM((C, HW), jnp.float32)],
        ),
        compiler_params=pltpu.CompilerParams(
            dimension_semantics=("parallel", "arbitrary"),
            vmem_limit_bytes=32 * 1024 * 1024),
    )(x, masks, w_slab, b_col, g_col, be_col, a_smem)

    return out.reshape(N, C, H, W)


def resmae_reference(x_nchw, params):
    """Pure-JAX reference (XLA conv, NCHW) for verification."""
    w, b, g, be, a = params
    depth = w.shape[0]
    x = x_nchw.astype(jnp.float32)
    y = x
    for d in range(depth):
        h = y
        for su in range(2):
            h = lax.conv_general_dilated(
                h, w[d, su], window_strides=(1, 1), padding="SAME",
                dimension_numbers=("NCHW", "OIHW", "NCHW"),
                precision=lax.Precision.HIGHEST)
            h = h + b[d, su][None, :, None, None]
            h = jnp.where(h >= 0, h, a[d, su] * h)                    # PReLU
            mean = jnp.mean(h, axis=(2, 3), keepdims=True)            # InstanceNorm
            var = jnp.mean((h - mean) ** 2, axis=(2, 3), keepdims=True)
            h = (h - mean) * lax.rsqrt(var + 1e-5)
            h = h * g[d, su][None, :, None, None] + be[d, su][None, :, None, None]
        y = y + h
    return x + y


def init_params(key, depth, C):
    """Deterministic synthetic parameters matching the PyTorch module shapes.

    Per ResidualUnit, per subunit: Conv2d(C,C,3,bias) [OIHW] + PReLU(1)
    + InstanceNorm2d(C, affine=True).
    """
    kw, kb, kg, kbe = jax.random.split(key, 4)
    w = 0.1 * jax.random.normal(kw, (depth, 2, C, C, 3, 3), jnp.float32)
    b = 0.1 * jax.random.normal(kb, (depth, 2, C), jnp.float32)
    g = 1.0 + 0.1 * jax.random.normal(kg, (depth, 2, C), jnp.float32)   # IN weight
    be = 0.1 * jax.random.normal(kbe, (depth, 2, C), jnp.float32)       # IN bias
    a = jnp.full((depth, 2), 0.25, jnp.float32)                         # PReLU init
    return (w, b, g, be, a)


if __name__ == "__main__":
    N, C, H, W = 2, 4, 16, 16
    depth = 2

    key = jax.random.PRNGKey(0)
    kx, kp = jax.random.split(key)
    x = jax.random.normal(kx, (N, C, H, W), jnp.float32)
    params = init_params(kp, depth, C)

    out = jax.block_until_ready(resmae_forward(x, params))
    ref = jax.block_until_ready(resmae_reference(x, params))

    assert out.shape == (N, C, H, W)
    np.testing.assert_allclose(np.asarray(out), np.asarray(ref),
                               atol=2e-2, rtol=2e-2)
    print("KERNEL_OK")
</pallas_src>

<mosaic_0001>
module attributes {stable_mosaic.version = 11 : i64} {
  func.func @kernel(%arg0: i32, %arg1: i32, %arg2: memref<1x4x256xf32, #tpu.memory_space<vmem>>, %arg3: memref<9x1x256xf32, #tpu.memory_space<vmem>>, %arg4: memref<2x2x4x36xf32, #tpu.memory_space<vmem>>, %arg5: memref<2x2x4x1xf32, #tpu.memory_space<vmem>>, %arg6: memref<2x2x4x1xf32, #tpu.memory_space<vmem>>, %arg7: memref<2x2x4x1xf32, #tpu.memory_space<vmem>>, %arg8: memref<2x2xf32, #tpu.memory_space<smem>>, %arg9: memref<1x4x256xf32, #tpu.memory_space<vmem>>, %arg10: memref<4x256xf32, #tpu.memory_space<vmem>>) attributes {dimension_semantics = [#tpu.dimension_semantics<parallel>, #tpu.dimension_semantics<arbitrary>], iteration_bounds = array<i64: 2, 2>, scalar_prefetch = 0 : i64, scratch_operands = 1 : i64, tpu.core_type = #tpu.core_type<tc>, window_params = [{transform_indices = @transform_0, window_bounds = array<i64: 1, 4, 256>}, {pipeline_mode = #tpu.pipeline_mode<synchronous>, transform_indices = @transform_1, window_bounds = array<i64: 9, 1, 256>}, {pipeline_mode = #tpu.pipeline_mode<synchronous>, transform_indices = @transform_2, window_bounds = array<i64: 2, 2, 4, 36>}, {pipeline_mode = #tpu.pipeline_mode<synchronous>, transform_indices = @transform_3, window_bounds = array<i64: 2, 2, 4, 1>}, {pipeline_mode = #tpu.pipeline_mode<synchronous>, transform_indices = @transform_4, window_bounds = array<i64: 2, 2, 4, 1>}, {pipeline_mode = #tpu.pipeline_mode<synchronous>, transform_indices = @transform_5, window_bounds = array<i64: 2, 2, 4, 1>}, {transform_indices = @transform_6, window_bounds = array<i64: 2, 2>}, {transform_indices = @transform_7, window_bounds = array<i64: 1, 4, 256>}]} {
    %c0_i32 = arith.constant 0 : i32
    %0 = arith.cmpi eq, %arg1, %c0_i32 : i32
    %1 = arith.extui %0 : i1 to i32
    %c0_i32_0 = arith.constant 0 : i32
    %2 = arith.cmpi ne, %1, %c0_i32_0 : i32
    scf.if %2 {
      %c0_73 = arith.constant 0 : index
      %c0_74 = arith.constant 0 : index
      %c0_75 = arith.constant 0 : index
      %215 = vector.load %arg2[%c0_73, %c0_74, %c0_75] : memref<1x4x256xf32, #tpu.memory_space<vmem>>, vector<1x4x256xf32>
      %216 = vector.shape_cast %215 : vector<1x4x256xf32> to vector<4x256xf32>
      %c0_76 = arith.constant 0 : index
      %c0_77 = arith.constant 0 : index
      %217 = vector.load %arg10[%c0_76, %c0_77] : memref<4x256xf32, #tpu.memory_space<vmem>>, vector<4x256xf32>
      tpu.vector_store %arg10[%c0_76, %c0_77], %216 {strides = array<i32>} : memref<4x256xf32, #tpu.memory_space<vmem>>, vector<4x256xf32>,
    } else {
    }
    %c0 = arith.constant 0 : index
    %c0_1 = arith.constant 0 : index
    %3 = vector.load %arg10[%c0, %c0_1] : memref<4x256xf32, #tpu.memory_space<vmem>>, vector<4x256xf32>
    %4 = arith.index_cast %arg1 : i32 to index
    %c0_2 = arith.constant 0 : index
    %c0_3 = arith.constant 0 : index
    %c0_4 = arith.constant 0 : index
    %5 = vector.load %arg4[%4, %c0_2, %c0_3, %c0_4] : memref<2x2x4x36xf32, #tpu.memory_space<vmem>>, vector<1x2x4x36xf32>
    %6 = vector.shape_cast %5 : vector<1x2x4x36xf32> to vector<2x4x36xf32>
    %7 = arith.index_cast %arg1 : i32 to index
    %c0_5 = arith.constant 0 : index
    %c0_6 = arith.constant 0 : index
    %c0_7 = arith.constant 0 : index
    %8 = vector.load %arg5[%7, %c0_5, %c0_6, %c0_7] : memref<2x2x4x1xf32, #tpu.memory_space<vmem>>, vector<1x2x4x1xf32>
    %9 = vector.shape_cast %8 : vector<1x2x4x1xf32> to vector<2x4x1xf32>
    %10 = arith.index_cast %arg1 : i32 to index
    %c0_8 = arith.constant 0 : index
    %c0_9 = arith.constant 0 : index
    %c0_10 = arith.constant 0 : index
    %11 = vector.load %arg6[%10, %c0_8, %c0_9, %c0_10] : memref<2x2x4x1xf32, #tpu.memory_space<vmem>>, vector<1x2x4x1xf32>
    %12 = vector.shape_cast %11 : vector<1x2x4x1xf32> to vector<2x4x1xf32>
    %13 = arith.index_cast %arg1 : i32 to index
    %c0_11 = arith.constant 0 : index
    %c0_12 = arith.constant 0 : index
    %c0_13 = arith.constant 0 : index
    %14 = vector.load %arg7[%13, %c0_11, %c0_12, %c0_13] : memref<2x2x4x1xf32, #tpu.memory_space<vmem>>, vector<1x2x4x1xf32>
    %15 = vector.shape_cast %14 : vector<1x2x4x1xf32> to vector<2x4x1xf32>
    %16 = vector.extract_strided_slice %3 {offsets = [0, 239], sizes = [4, 17], strides = [1, 1]} : vector<4x256xf32> to vector<4x17xf32>
    %17 = vector.extract_strided_slice %3 {offsets = [0, 0], sizes = [4, 239], strides = [1, 1]} : vector<4x256xf32> to vector<4x239xf32>
    %18 = tpu.concatenate %16, %17 in 1 : vector<4x17xf32>, vector<4x239xf32> -> vector<4x256xf32>
    %c0_14 = arith.constant 0 : index
    %c0_15 = arith.constant 0 : index
    %c0_16 = arith.constant 0 : index
    %19 = vector.load %arg3[%c0_14, %c0_15, %c0_16] : memref<9x1x256xf32, #tpu.memory_space<vmem>>, vector<1x1x256xf32>
    %20 = vector.shape_cast %19 : vector<1x1x256xf32> to vector<1x256xf32>
    %21 = vector.broadcast %20 : vector<1x256xf32> to vector<4x256xf32>
    %22 = arith.mulf %18, %21 : vector<4x256xf32>
    %23 = vector.extract_strided_slice %3 {offsets = [0, 240], sizes = [4, 16], strides = [1, 1]} : vector<4x256xf32> to vector<4x16xf32>
    %24 = vector.extract_strided_slice %3 {offsets = [0, 0], sizes = [4, 240], strides = [1, 1]} : vector<4x256xf32> to vector<4x240xf32>
    %25 = tpu.concatenate %23, %24 in 1 : vector<4x16xf32>, vector<4x240xf32> -> vector<4x256xf32>
    %c1 = arith.constant 1 : index
    %c0_17 = arith.constant 0 : index
    %c0_18 = arith.constant 0 : index
    %26 = vector.load %arg3[%c1, %c0_17, %c0_18] : memref<9x1x256xf32, #tpu.memory_space<vmem>>, vector<1x1x256xf32>
    %27 = vector.shape_cast %26 : vector<1x1x256xf32> to vector<1x256xf32>
    %28 = vector.broadcast %27 : vector<1x256xf32> to vector<4x256xf32>
    %29 = arith.mulf %25, %28 : vector<4x256xf32>
    %30 = vector.extract_strided_slice %3 {offsets = [0, 241], sizes = [4, 15], strides = [1, 1]} : vector<4x256xf32> to vector<4x15xf32>
    %31 = vector.extract_strided_slice %3 {offsets = [0, 0], sizes = [4, 241], strides = [1, 1]} : vector<4x256xf32> to vector<4x241xf32>
    %32 = tpu.concatenate %30, %31 in 1 : vector<4x15xf32>, vector<4x241xf32> -> vector<4x256xf32>
    %c2 = arith.constant 2 : index
    %c0_19 = arith.constant 0 : index
    %c0_20 = arith.constant 0 : index
    %33 = vector.load %arg3[%c2, %c0_19, %c0_20] : memref<9x1x256xf32, #tpu.memory_space<vmem>>, vector<1x1x256xf32>
    %34 = vector.shape_cast %33 : vector<1x1x256xf32> to vector<1x256xf32>
    %35 = vector.broadcast %34 : vector<1x256xf32> to vector<4x256xf32>
    %36 = arith.mulf %32, %35 : vector<4x256xf32>
    %37 = vector.extract_strided_slice %3 {offsets = [0, 255], sizes = [4, 1], strides = [1, 1]} : vector<4x256xf32> to vector<4x1xf32>
    %38 = vector.extract_strided_slice %3 {offsets = [0, 0], sizes = [4, 255], strides = [1, 1]} : vector<4x256xf32> to vector<4x255xf32>
    %39 = tpu.concatenate %37, %38 in 1 : vector<4x1xf32>, vector<4x255xf32> -> vector<4x256xf32>
    %c3 = arith.constant 3 : index
    %c0_21 = arith.constant 0 : index
    %c0_22 = arith.constant 0 : index
    %40 = vector.load %arg3[%c3, %c0_21, %c0_22] : memref<9x1x256xf32, #tpu.memory_space<vmem>>, vector<1x1x256xf32>
    %41 = vector.shape_cast %40 : vector<1x1x256xf32> to vector<1x256xf32>
    %42 = vector.broadcast %41 : vector<1x256xf32> to vector<4x256xf32>
    %43 = arith.mulf %39, %42 : vector<4x256xf32>
    %44 = vector.extract_strided_slice %3 {offsets = [0, 1], sizes = [4, 255], strides = [1, 1]} : vector<4x256xf32> to vector<4x255xf32>
    %45 = vector.extract_strided_slice %3 {offsets = [0, 0], sizes = [4, 1], strides = [1, 1]} : vector<4x256xf32> to vector<4x1xf32>
    %46 = tpu.concatenate %44, %45 in 1 : vector<4x255xf32>, vector<4x1xf32> -> vector<4x256xf32>
    %c5 = arith.constant 5 : index
    %c0_23 = arith.constant 0 : index
    %c0_24 = arith.constant 0 : index
    %47 = vector.load %arg3[%c5, %c0_23, %c0_24] : memref<9x1x256xf32, #tpu.memory_space<vmem>>, vector<1x1x256xf32>
    %48 = vector.shape_cast %47 : vector<1x1x256xf32> to vector<1x256xf32>
    %49 = vector.broadcast %48 : vector<1x256xf32> to vector<4x256xf32>
    %50 = arith.mulf %46, %49 : vector<4x256xf32>
    %51 = vector.extract_strided_slice %3 {offsets = [0, 15], sizes = [4, 241], strides = [1, 1]} : vector<4x256xf32> to vector<4x241xf32>
    %52 = vector.extract_strided_slice %3 {offsets = [0, 0], sizes = [4, 15], strides = [1, 1]} : vector<4x256xf32> to vector<4x15xf32>
    %53 = tpu.concatenate %51, %52 in 1 : vector<4x241xf32>, vector<4x15xf32> -> vector<4x256xf32>
    %c6 = arith.constant 6 : index
    %c0_25 = arith.constant 0 : index
    %c0_26 = arith.constant 0 : index
    %54 = vector.load %arg3[%c6, %c0_25, %c0_26] : memref<9x1x256xf32, #tpu.memory_space<vmem>>, vector<1x1x256xf32>
    %55 = vector.shape_cast %54 : vector<1x1x256xf32> to vector<1x256xf32>
    %56 = vector.broadcast %55 : vector<1x256xf32> to vector<4x256xf32>
    %57 = arith.mulf %53, %56 : vector<4x256xf32>
    %58 = vector.extract_strided_slice %3 {offsets = [0, 16], sizes = [4, 240], strides = [1, 1]} : vector<4x256xf32> to vector<4x240xf32>
    %59 = vector.extract_strided_slice %3 {offsets = [0, 0], sizes = [4, 16], strides = [1, 1]} : vector<4x256xf32> to vector<4x16xf32>
    %60 = tpu.concatenate %58, %59 in 1 : vector<4x240xf32>, vector<4x16xf32> -> vector<4x256xf32>
    %c7 = arith.constant 7 : index
    %c0_27 = arith.constant 0 : index
    %c0_28 = arith.constant 0 : index
    %61 = vector.load %arg3[%c7, %c0_27, %c0_28] : memref<9x1x256xf32, #tpu.memory_space<vmem>>, vector<1x1x256xf32>
    %62 = vector.shape_cast %61 : vector<1x1x256xf32> to vector<1x256xf32>
    %63 = vector.broadcast %62 : vector<1x256xf32> to vector<4x256xf32>
    %64 = arith.mulf %60, %63 : vector<4x256xf32>
    %65 = vector.extract_strided_slice %3 {offsets = [0, 17], sizes = [4, 239], strides = [1, 1]} : vector<4x256xf32> to vector<4x239xf32>
    %66 = vector.extract_strided_slice %3 {offsets = [0, 0], sizes = [4, 17], strides = [1, 1]} : vector<4x256xf32> to vector<4x17xf32>
    %67 = tpu.concatenate %65, %66 in 1 : vector<4x239xf32>, vector<4x17xf32> -> vector<4x256xf32>
    %c8 = arith.constant 8 : index
    %c0_29 = arith.constant 0 : index
    %c0_30 = arith.constant 0 : index
    %68 = vector.load %arg3[%c8, %c0_29, %c0_30] : memref<9x1x256xf32, #tpu.memory_space<vmem>>, vector<1x1x256xf32>
    %69 = vector.shape_cast %68 : vector<1x1x256xf32> to vector<1x256xf32>
    %70 = vector.broadcast %69 : vector<1x256xf32> to vector<4x256xf32>
    %71 = arith.mulf %67, %70 : vector<4x256xf32>
    %72 = tpu.concatenate %22, %29, %36, %43, %3, %50, %57, %64, %71 in 0 : vector<4x256xf32>, vector<4x256xf32>, vector<4x256xf32>, vector<4x256xf32>, vector<4x256xf32>, vector<4x256xf32>, vector<4x256xf32>, vector<4x256xf32>, vector<4x256xf32> -> vector<36x256xf32>
    %73 = vector.extract_strided_slice %6 {offsets = [0, 0, 0], sizes = [1, 4, 36], strides = [1, 1, 1]} : vector<2x4x36xf32> to vector<1x4x36xf32>
    %74 = vector.shape_cast %73 : vector<1x4x36xf32> to vector<4x36xf32>
    %cst = arith.constant dense<0.000000e+00> : vector<4x256xf32>
    %75 = tpu.matmul %74, %72, %cst {dimension_numbers = #tpu.dot_dimension_numbers<[1], [0], [0], [1], [0, 0, 1, 1], [], []>} : vector<4x36xf32>, vector<36x256xf32>, vector<4x256xf32> -> vector<4x256xf32>
    %76 = vector.extract_strided_slice %9 {offsets = [0, 0, 0], sizes = [1, 4, 1], strides = [1, 1, 1]} : vector<2x4x1xf32> to vector<1x4x1xf32>
    %77 = vector.shape_cast %76 : vector<1x4x1xf32> to vector<4x1xf32>
    %78 = vector.broadcast %77 : vector<4x1xf32> to vector<4x256xf32>
    %79 = arith.addf %75, %78 : vector<4x256xf32>
    %80 = arith.index_cast %arg1 : i32 to index
    %c0_31 = arith.constant 0 : index
    %81 = memref.load %arg8[%80, %c0_31] : memref<2x2xf32, #tpu.memory_space<smem>>
    %cst_32 = arith.constant 0.000000e+00 : f32
    %82 = vector.broadcast %cst_32 : f32 to vector<4x256xf32>
    %83 = arith.cmpf oge, %79, %82 : vector<4x256xf32>
    %84 = vector.broadcast %81 : f32 to vector<4x256xf32>
    %85 = arith.mulf %84, %79 : vector<4x256xf32>
    %86 = arith.select %83, %79, %85 : vector<4x256xi1>, vector<4x256xf32>
    %cst_33 = arith.constant dense<0.000000e+00> : vector<4xf32>
    %87 = vector.multi_reduction <add>, %86, %cst_33 [1] : vector<4x256xf32> to vector<4xf32>
    %88 = vector.shape_cast %87 : vector<4xf32> to vector<4x1xf32>
    %cst_34 = arith.constant 2.560000e+02 : f32
    %89 = vector.broadcast %cst_34 : f32 to vector<4x1xf32>
    %90 = arith.divf %88, %89 : vector<4x1xf32>
    %91 = arith.mulf %86, %86 : vector<4x256xf32>
    %cst_35 = arith.constant dense<0.000000e+00> : vector<4xf32>
    %92 = vector.multi_reduction <add>, %91, %cst_35 [1] : vector<4x256xf32> to vector<4xf32>
    %93 = vector.shape_cast %92 : vector<4xf32> to vector<4x1xf32>
    %cst_36 = arith.constant 2.560000e+02 : f32
    %94 = vector.broadcast %cst_36 : f32 to vector<4x1xf32>
    %95 = arith.divf %93, %94 : vector<4x1xf32>
    %96 = arith.mulf %90, %90 : vector<4x1xf32>
    %97 = arith.subf %95, %96 : vector<4x1xf32>
    %98 = vector.broadcast %90 : vector<4x1xf32> to vector<4x256xf32>
    %99 = arith.subf %86, %98 : vector<4x256xf32>
    %cst_37 = arith.constant 9.99999974E-6 : f32
    %100 = vector.broadcast %cst_37 : f32 to vector<4x1xf32>
    %101 = arith.addf %97, %100 : vector<4x1xf32>
    %102 = math.rsqrt %101 : vector<4x1xf32>
    %103 = vector.broadcast %102 : vector<4x1xf32> to vector<4x256xf32>
    %104 = arith.mulf %99, %103 : vector<4x256xf32>
    %105 = vector.extract_strided_slice %12 {offsets = [0, 0, 0], sizes = [1, 4, 1], strides = [1, 1, 1]} : vector<2x4x1xf32> to vector<1x4x1xf32>
    %106 = vector.shape_cast %105 : vector<1x4x1xf32> to vector<4x1xf32>
    %107 = vector.broadcast %106 : vector<4x1xf32> to vector<4x256xf32>
    %108 = arith.mulf %104, %107 : vector<4x256xf32>
    %109 = vector.extract_strided_slice %15 {offsets = [0, 0, 0], sizes = [1, 4, 1], strides = [1, 1, 1]} : vector<2x4x1xf32> to vector<1x4x1xf32>
    %110 = vector.shape_cast %109 : vector<1x4x1xf32> to vector<4x1xf32>
    %111 = vector.broadcast %110 : vector<4x1xf32> to vector<4x256xf32>
    %112 = arith.addf %108, %111 : vector<4x256xf32>
    %113 = vector.extract_strided_slice %112 {offsets = [0, 239], sizes = [4, 17], strides = [1, 1]} : vector<4x256xf32> to vector<4x17xf32>
    %114 = vector.extract_strided_slice %112 {offsets = [0, 0], sizes = [4, 239], strides = [1, 1]} : vector<4x256xf32> to vector<4x239xf32>
    %115 = tpu.concatenate %113, %114 in 1 : vector<4x17xf32>, vector<4x239xf32> -> vector<4x256xf32>
    %c0_38 = arith.constant 0 : index
    %c0_39 = arith.constant 0 : index
    %c0_40 = arith.constant 0 : index
    %116 = vector.load %arg3[%c0_38, %c0_39, %c0_40] : memref<9x1x256xf32, #tpu.memory_space<vmem>>, vector<1x1x256xf32>
    %117 = vector.shape_cast %116 : vector<1x1x256xf32> to vector<1x256xf32>
    %118 = vector.broadcast %117 : vector<1x256xf32> to vector<4x256xf32>
    %119 = arith.mulf %115, %118 : vector<4x256xf32>
    %120 = vector.extract_strided_slice %112 {offsets = [0, 240], sizes = [4, 16], strides = [1, 1]} : vector<4x256xf32> to vector<4x16xf32>
    %121 = vector.extract_strided_slice %112 {offsets = [0, 0], sizes = [4, 240], strides = [1, 1]} : vector<4x256xf32> to vector<4x240xf32>
    %122 = tpu.concatenate %120, %121 in 1 : vector<4x16xf32>, vector<4x240xf32> -> vector<4x256xf32>
    %c1_41 = arith.constant 1 : index
    %c0_42 = arith.constant 0 : index
    %c0_43 = arith.constant 0 : index
    %123 = vector.load %arg3[%c1_41, %c0_42, %c0_43] : memref<9x1x256xf32, #tpu.memory_space<vmem>>, vector<1x1x256xf32>
    %124 = vector.shape_cast %123 : vector<1x1x256xf32> to vector<1x256xf32>
    %125 = vector.broadcast %124 : vector<1x256xf32> to vector<4x256xf32>
    %126 = arith.mulf %122, %125 : vector<4x256xf32>
    %127 = vector.extract_strided_slice %112 {offsets = [0, 241], sizes = [4, 15], strides = [1, 1]} : vector<4x256xf32> to vector<4x15xf32>
    %128 = vector.extract_strided_slice %112 {offsets = [0, 0], sizes = [4, 241], strides = [1, 1]} : vector<4x256xf32> to vector<4x241xf32>
    %129 = tpu.concatenate %127, %128 in 1 : vector<4x15xf32>, vector<4x241xf32> -> vector<4x256xf32>
    %c2_44 = arith.constant 2 : index
    %c0_45 = arith.constant 0 : index
    %c0_46 = arith.constant 0 : index
    %130 = vector.load %arg3[%c2_44, %c0_45, %c0_46] : memref<9x1x256xf32, #tpu.memory_space<vmem>>, vector<1x1x256xf32>
    %131 = vector.shape_cast %130 : vector<1x1x256xf32> to vector<1x256xf32>
    %132 = vector.broadcast %131 : vector<1x256xf32> to vector<4x256xf32>
    %133 = arith.mulf %129, %132 : vector<4x256xf32>
    %134 = vector.extract_strided_slice %112 {offsets = [0, 255], sizes = [4, 1], strides = [1, 1]} : vector<4x256xf32> to vector<4x1xf32>
    %135 = vector.extract_strided_slice %112 {offsets = [0, 0], sizes = [4, 255], strides = [1, 1]} : vector<4x256xf32> to vector<4x255xf32>
    %136 = tpu.concatenate %134, %135 in 1 : vector<4x1xf32>, vector<4x255xf32> -> vector<4x256xf32>
    %c3_47 = arith.constant 3 : index
    %c0_48 = arith.constant 0 : index
    %c0_49 = arith.constant 0 : index
    %137 = vector.load %arg3[%c3_47, %c0_48, %c0_49] : memref<9x1x256xf32, #tpu.memory_space<vmem>>, vector<1x1x256xf32>
    %138 = vector.shape_cast %137 : vector<1x1x256xf32> to vector<1x256xf32>
    %139 = vector.broadcast %138 : vector<1x256xf32> to vector<4x256xf32>
    %140 = arith.mulf %136, %139 : vector<4x256xf32>
    %141 = vector.extract_strided_slice %112 {offsets = [0, 1], sizes = [4, 255], strides = [1, 1]} : vector<4x256xf32> to vector<4x255xf32>
    %142 = vector.extract_strided_slice %112 {offsets = [0, 0], sizes = [4, 1], strides = [1, 1]} : vector<4x256xf32> to vector<4x1xf32>
    %143 = tpu.concatenate %141, %142 in 1 : vector<4x255xf32>, vector<4x1xf32> -> vector<4x256xf32>
    %c5_50 = arith.constant 5 : index
    %c0_51 = arith.constant 0 : index
    %c0_52 = arith.constant 0 : index
    %144 = vector.load %arg3[%c5_50, %c0_51, %c0_52] : memref<9x1x256xf32, #tpu.memory_space<vmem>>, vector<1x1x256xf32>
    %145 = vector.shape_cast %144 : vector<1x1x256xf32> to vector<1x256xf32>
    %146 = vector.broadcast %145 : vector<1x256xf32> to vector<4x256xf32>
    %147 = arith.mulf %143, %146 : vector<4x256xf32>
    %148 = vector.extract_strided_slice %112 {offsets = [0, 15], sizes = [4, 241], strides = [1, 1]} : vector<4x256xf32> to vector<4x241xf32>
    %149 = vector.extract_strided_slice %112 {offsets = [0, 0], sizes = [4, 15], strides = [1, 1]} : vector<4x256xf32> to vector<4x15xf32>
    %150 = tpu.concatenate %148, %149 in 1 : vector<4x241xf32>, vector<4x15xf32> -> vector<4x256xf32>
    %c6_53 = arith.constant 6 : index
    %c0_54 = arith.constant 0 : index
    %c0_55 = arith.constant 0 : index
    %151 = vector.load %arg3[%c6_53, %c0_54, %c0_55] : memref<9x1x256xf32, #tpu.memory_space<vmem>>, vector<1x1x256xf32>
    %152 = vector.shape_cast %151 : vector<1x1x256xf32> to vector<1x256xf32>
    %153 = vector.broadcast %152 : vector<1x256xf32> to vector<4x256xf32>
    %154 = arith.mulf %150, %153 : vector<4x256xf32>
    %155 = vector.extract_strided_slice %112 {offsets = [0, 16], sizes = [4, 240], strides = [1, 1]} : vector<4x256xf32> to vector<4x240xf32>
    %156 = vector.extract_strided_slice %112 {offsets = [0, 0], sizes = [4, 16], strides = [1, 1]} : vector<4x256xf32> to vector<4x16xf32>
    %157 = tpu.concatenate %155, %156 in 1 : vector<4x240xf32>, vector<4x16xf32> -> vector<4x256xf32>
    %c7_56 = arith.constant 7 : index
    %c0_57 = arith.constant 0 : index
    %c0_58 = arith.constant 0 : index
    %158 = vector.load %arg3[%c7_56, %c0_57, %c0_58] : memref<9x1x256xf32, #tpu.memory_space<vmem>>, vector<1x1x256xf32>
    %159 = vector.shape_cast %158 : vector<1x1x256xf32> to vector<1x256xf32>
    %160 = vector.broadcast %159 : vector<1x256xf32> to vector<4x256xf32>
    %161 = arith.mulf %157, %160 : vector<4x256xf32>
    %162 = vector.extract_strided_slice %112 {offsets = [0, 17], sizes = [4, 239], strides = [1, 1]} : vector<4x256xf32> to vector<4x239xf32>
    %163 = vector.extract_strided_slice %112 {offsets = [0, 0], sizes = [4, 17], strides = [1, 1]} : vector<4x256xf32> to vector<4x17xf32>
    %164 = tpu.concatenate %162, %163 in 1 : vector<4x239xf32>, vector<4x17xf32> -> vector<4x256xf32>
    %c8_59 = arith.constant 8 : index
    %c0_60 = arith.constant 0 : index
    %c0_61 = arith.constant 0 : index
    %165 = vector.load %arg3[%c8_59, %c0_60, %c0_61] : memref<9x1x256xf32, #tpu.memory_space<vmem>>, vector<1x1x256xf32>
    %166 = vector.shape_cast %165 : vector<1x1x256xf32> to vector<1x256xf32>
    %167 = vector.broadcast %166 : vector<1x256xf32> to vector<4x256xf32>
    %168 = arith.mulf %164, %167 : vector<4x256xf32>
    %169 = tpu.concatenate %119, %126, %133, %140, %112, %147, %154, %161, %168 in 0 : vector<4x256xf32>, vector<4x256xf32>, vector<4x256xf32>, vector<4x256xf32>, vector<4x256xf32>, vector<4x256xf32>, vector<4x256xf32>, vector<4x256xf32>, vector<4x256xf32> -> vector<36x256xf32>
    %170 = vector.extract_strided_slice %6 {offsets = [1, 0, 0], sizes = [1, 4, 36], strides = [1, 1, 1]} : vector<2x4x36xf32> to vector<1x4x36xf32>
    %171 = vector.shape_cast %170 : vector<1x4x36xf32> to vector<4x36xf32>
    %cst_62 = arith.constant dense<0.000000e+00> : vector<4x256xf32>
    %172 = tpu.matmul %171, %169, %cst_62 {dimension_numbers = #tpu.dot_dimension_numbers<[1], [0], [0], [1], [0, 0, 1, 1], [], []>} : vector<4x36xf32>, vector<36x256xf32>, vector<4x256xf32> -> vector<4x256xf32>
    %173 = vector.extract_strided_slice %9 {offsets = [1, 0, 0], sizes = [1, 4, 1], strides = [1, 1, 1]} : vector<2x4x1xf32> to vector<1x4x1xf32>
    %174 = vector.shape_cast %173 : vector<1x4x1xf32> to vector<4x1xf32>
    %175 = vector.broadcast %174 : vector<4x1xf32> to vector<4x256xf32>
    %176 = arith.addf %172, %175 : vector<4x256xf32>
    %177 = arith.index_cast %arg1 : i32 to index
    %c1_63 = arith.constant 1 : index
    %178 = memref.load %arg8[%177, %c1_63] : memref<2x2xf32, #tpu.memory_space<smem>>
    %cst_64 = arith.constant 0.000000e+00 : f32
    %179 = vector.broadcast %cst_64 : f32 to vector<4x256xf32>
    %180 = arith.cmpf oge, %176, %179 : vector<4x256xf32>
    %181 = vector.broadcast %178 : f32 to vector<4x256xf32>
    %182 = arith.mulf %181, %176 : vector<4x256xf32>
    %183 = arith.select %180, %176, %182 : vector<4x256xi1>, vector<4x256xf32>
    %cst_65 = arith.constant dense<0.000000e+00> : vector<4xf32>
    %184 = vector.multi_reduction <add>, %183, %cst_65 [1] : vector<4x256xf32> to vector<4xf32>
    %185 = vector.shape_cast %184 : vector<4xf32> to vector<4x1xf32>
    %cst_66 = arith.constant 2.560000e+02 : f32
    %186 = vector.broadcast %cst_66 : f32 to vector<4x1xf32>
    %187 = arith.divf %185, %186 : vector<4x1xf32>
    %188 = arith.mulf %183, %183 : vector<4x256xf32>
    %cst_67 = arith.constant dense<0.000000e+00> : vector<4xf32>
    %189 = vector.multi_reduction <add>, %188, %cst_67 [1] : vector<4x256xf32> to vector<4xf32>
    %190 = vector.shape_cast %189 : vector<4xf32> to vector<4x1xf32>
    %cst_68 = arith.constant 2.560000e+02 : f32
    %191 = vector.broadcast %cst_68 : f32 to vector<4x1xf32>
    %192 = arith.divf %190, %191 : vector<4x1xf32>
    %193 = arith.mulf %187, %187 : vector<4x1xf32>
    %194 = arith.subf %192, %193 : vector<4x1xf32>
    %195 = vector.broadcast %187 : vector<4x1xf32> to vector<4x256xf32>
    %196 = arith.subf %183, %195 : vector<4x256xf32>
    %cst_69 = arith.constant 9.99999974E-6 : f32
    %197 = vector.broadcast %cst_69 : f32 to vector<4x1xf32>
    %198 = arith.addf %194, %197 : vector<4x1xf32>
    %199 = math.rsqrt %198 : vector<4x1xf32>
    %200 = vector.broadcast %199 : vector<4x1xf32> to vector<4x256xf32>
    %201 = arith.mulf %196, %200 : vector<4x256xf32>
    %202 = vector.extract_strided_slice %12 {offsets = [1, 0, 0], sizes = [1, 4, 1], strides = [1, 1, 1]} : vector<2x4x1xf32> to vector<1x4x1xf32>
    %203 = vector.shape_cast %202 : vector<1x4x1xf32> to vector<4x1xf32>
    %204 = vector.broadcast %203 : vector<4x1xf32> to vector<4x256xf32>
    %205 = arith.mulf %201, %204 : vector<4x256xf32>
    %206 = vector.extract_strided_slice %15 {offsets = [1, 0, 0], sizes = [1, 4, 1], strides = [1, 1, 1]} : vector<2x4x1xf32> to vector<1x4x1xf32>
    %207 = vector.shape_cast %206 : vector<1x4x1xf32> to vector<4x1xf32>
    %208 = vector.broadcast %207 : vector<4x1xf32> to vector<4x256xf32>
    %209 = arith.addf %205, %208 : vector<4x256xf32>
    %210 = arith.addf %3, %209 : vector<4x256xf32>
    %c0_70 = arith.constant 0 : index
    %c0_71 = arith.constant 0 : index
    %211 = vector.load %arg10[%c0_70, %c0_71] : memref<4x256xf32, #tpu.memory_space<vmem>>, vector<4x256xf32>
    tpu.vector_store %arg10[%c0_70, %c0_71], %210 {strides = array<i32>} : memref<4x256xf32, #tpu.memory_space<vmem>>, vector<4x256xf32>,
    %c1_i32 = arith.constant 1 : i32
    %212 = arith.cmpi eq, %arg1, %c1_i32 : i32
    %213 = arith.extui %212 : i1 to i32
    %c0_i32_72 = arith.constant 0 : i32
    %214 = arith.cmpi ne, %213, %c0_i32_72 : i32
    scf.if %214 {
      %c0_73 = arith.constant 0 : index
      %c0_74 = arith.constant 0 : index
      %c0_75 = arith.constant 0 : index
      %215 = vector.load %arg2[%c0_73, %c0_74, %c0_75] : memref<1x4x256xf32, #tpu.memory_space<vmem>>, vector<1x4x256xf32>
      %216 = vector.shape_cast %215 : vector<1x4x256xf32> to vector<4x256xf32>
      %c0_76 = arith.constant 0 : index
      %c0_77 = arith.constant 0 : index
      %217 = vector.load %arg10[%c0_76, %c0_77] : memref<4x256xf32, #tpu.memory_space<vmem>>, vector<4x256xf32>
      %218 = arith.addf %216, %217 : vector<4x256xf32>
      %c0_78 = arith.constant 0 : index
      %c0_79 = arith.constant 0 : index
      %c0_80 = arith.constant 0 : index
      %219 = vector.load %arg9[%c0_78, %c0_79, %c0_80] : memref<1x4x256xf32, #tpu.memory_space<vmem>>, vector<1x4x256xf32>
      %220 = vector.shape_cast %219 : vector<1x4x256xf32> to vector<4x256xf32>
      %221 = vector.shape_cast %218 : vector<4x256xf32> to vector<1x4x256xf32>
      tpu.vector_store %arg9[%c0_78, %c0_79, %c0_80], %221 {strides = array<i32>} : memref<1x4x256xf32, #tpu.memory_space<vmem>>, vector<1x4x256xf32>,
    } else {
    }
    return
  }
  func.func @transform_0(%arg0: i32, %arg1: i32) -> (i32, i32, i32) {
    %c0_i32 = arith.constant 0 : i32
    %c0_i32_0 = arith.constant 0 : i32
    %c0_i32_1 = arith.constant 0 : i32
    return %arg0, %c0_i32, %c0_i32_0 : i32, i32, i32
  }
  func.func @transform_1(%arg0: i32, %arg1: i32) -> (i32, i32, i32) {
    %c0_i32 = arith.constant 0 : i32
    %c0_i32_0 = arith.constant 0 : i32
    %c0_i32_1 = arith.constant 0 : i32
    %c0_i32_2 = arith.constant 0 : i32
    return %c0_i32, %c0_i32_0, %c0_i32_1 : i32, i32, i32
  }
  func.func @transform_2(%arg0: i32, %arg1: i32) -> (i32, i32, i32, i32) {
    %c0_i32 = arith.constant 0 : i32
    %c0_i32_0 = arith.constant 0 : i32
    %c0_i32_1 = arith.constant 0 : i32
    %c0_i32_2 = arith.constant 0 : i32
    %c0_i32_3 = arith.constant 0 : i32
    return %c0_i32, %c0_i32_0, %c0_i32_1, %c0_i32_2 : i32, i32, i32, i32
  }
  func.func @transform_3(%arg0: i32, %arg1: i32) -> (i32, i32, i32, i32) {
    %c0_i32 = arith.constant 0 : i32
    %c0_i32_0 = arith.constant 0 : i32
    %c0_i32_1 = arith.constant 0 : i32
    %c0_i32_2 = arith.constant 0 : i32
    %c0_i32_3 = arith.constant 0 : i32
    return %c0_i32, %c0_i32_0, %c0_i32_1, %c0_i32_2 : i32, i32, i32, i32
  }
  func.func @transform_4(%arg0: i32, %arg1: i32) -> (i32, i32, i32, i32) {
    %c0_i32 = arith.constant 0 : i32
    %c0_i32_0 = arith.constant 0 : i32
    %c0_i32_1 = arith.constant 0 : i32
    %c0_i32_2 = arith.constant 0 : i32
    %c0_i32_3 = arith.constant 0 : i32
    return %c0_i32, %c0_i32_0, %c0_i32_1, %c0_i32_2 : i32, i32, i32, i32
  }
  func.func @transform_5(%arg0: i32, %arg1: i32) -> (i32, i32, i32, i32) {
    %c0_i32 = arith.constant 0 : i32
    %c0_i32_0 = arith.constant 0 : i32
    %c0_i32_1 = arith.constant 0 : i32
    %c0_i32_2 = arith.constant 0 : i32
    %c0_i32_3 = arith.constant 0 : i32
    return %c0_i32, %c0_i32_0, %c0_i32_1, %c0_i32_2 : i32, i32, i32, i32
  }
  func.func @transform_6(%arg0: i32, %arg1: i32) -> (i32, i32) {
    %c0_i32 = arith.constant 0 : i32
    %c0_i32_0 = arith.constant 0 : i32
    %c0_i32_1 = arith.constant 0 : i32
    return %c0_i32, %c0_i32_0 : i32, i32
  }
  func.func @transform_7(%arg0: i32, %arg1: i32) -> (i32, i32, i32) {
    %c0_i32 = arith.constant 0 : i32
    %c0_i32_0 = arith.constant 0 : i32
    %c0_i32_1 = arith.constant 0 : i32
    return %arg0, %c0_i32, %c0_i32_0 : i32, i32, i32
  }
}

</mosaic_0001>

<bundles_post_ra>
// kernel: tpu_custom_call.1
= control target key start
LH: loop header
LB: loop body
LE: loop exit
PB: predicated region body
PF: predicated region fallthrough
CT: control target
= control target key end

     0   :  { %s1807_s0 = inlined_call_operand.vmem [shape: f32[2,4,256], index: 0, kind: input, shape index: {}]   ;;  %s1808_s1 = inlined_call_operand.vmem [shape: f32[9,1,256], index: 1, kind: input, shape index: {}]   ;;  %s1809_s2 = inlined_call_operand.vmem [shape: f32[2,2,4,36], index: 2, kind: input, shape index: {}]   ;;  %s1810_s3 = inlined_call_operand.vmem [shape: f32[2,2,4,1], index: 3, kind: input, shape index: {}]   ;;  %s1811_s4 = inlined_call_operand.vmem [shape: f32[2,2,4,1], index: 4, kind: input, shape index: {}]   ;;  %s1812_s5 = inlined_call_operand.vmem [shape: f32[2,2,4,1], index: 5, kind: input, shape index: {}]   ;;  %s1813_s6 = inlined_call_operand.vmem [shape: f32[2,2], index: 6, kind: input, shape index: {}]   ;;  %s1814_s7 = inlined_call_operand.hbm [shape: f32[2,4,256], index: 7, kind: output, shape index: {}]  }
   0x1   :  { %1833 = sst [smem:[#allocation9_spill]] %s1807_s0 }
   0x2   :  { %1834 = sst [smem:[#allocation10_spill]] %s1808_s1 }
   0x3   :  { %1835 = sst [smem:[#allocation11_spill]] %s1809_s2 }
   0x4   :  { %1836 = sst [smem:[#allocation12_spill]] %s1810_s3 }
   0x5   :  { %12 = vsyncpa [#allocation5], 0 }
   0x6   :  { %13 = vsyncpa [#allocation4], 0 }
   0x7   :  { %15 = vsyncpa [#allocation4 + $0x1], 0  ;;  %s1339_s24 = smov 0   ;;  %s1341_s25 = smov 0  }
   0x8   :  { %s1343_s26 = smov 0   ;;  %s1345_s27 = smov 0  }
   0x9   :  { %s1347_s28 = smov 0   ;;  %s1349_s29 = smov 0  }
   0xa   :  { %s1351_s30 = smov 0   ;;  %s1353_s8 = smov 0  }
   0xb LB: > { %s1037_s9 = sadd.s32 4294967295, %s1286_s8   ;;  %s1038_s10 = sadd.s32 4294967294, %s1286_s8   ;;  %s1286_s8 = sphi %s1353_s8, %s21_s8   ;;  %s1282_s30 = sphi %s1351_s30, %s1861_s30   ;;  %s1278_s29 = sphi %s1349_s29, %s1860_s29   ;;  %s1274_s28 = sphi %s1347_s28, %s1859_s28   ;;  %s1270_s27 = sphi %s1345_s27, %s1858_s27   ;;  %s1266_s26 = sphi %s1343_s26, %s1857_s26   ;;  %s1262_s25 = sphi %s1341_s25, %s1856_s25   ;;  %s1258_s24 = sphi %s1339_s24, %s1855_s24  }
   0xc   : > { %s30_s11 = sadd.s32 1, %s1278_s29  ;;  %s33_s12 = sadd.s32 1, %s1282_s30 }
   0xd   : > { %p31_p0 = scmp.ge.s32.totalorder %s30_s11, 2  ;;  %s192_s13 = sadd.s32 1, %s1266_s26 }
   0xe   : > { %p202_p1 = scmp.ne.s32.totalorder %s1266_s26, %s1262_s25  ;;  %p203_p2 = scmp.eq.s32.totalorder %s1037_s9, 3 }
   0xf   : > { %s1863_s11 = smov (%p31_p0, %s30_s11), 0  ;;  %s1865_s12 = smov (!%p31_p0, %s33_s12), %s1282_s30 }
  0x10   : > { %p1389_p3 = por %p203_p2, %p202_p1  ;;  %p208_p4 = scmp.ne.s32.totalorder %s1262_s25, %s1258_s24 }
  0x11   : > { %p35_p5 = scmp.ge.s32.totalorder %s1865_s12, 2  ;;  %p209_p6 = scmp.eq.s32.totalorder %s1038_s10, 3 }
  0x12   : > { %p1039_p7 = scmp.ge.s32.totalorder %s1286_s8, 1  ;;  %p216_p8 = scmp.lt.s32.totalorder %s1286_s8, 5 }
  0x13   : > { %s1867_s12 = smov (%p35_p5, %s1865_s12), 0  ;;  %p1399_p9 = por %p209_p6, %p208_p4 }
  0x14   : > { %p217_p10 = pnand %p1039_p7, %p216_p8  ;;  %s189_s16 = ssub.s32 %s1282_s30, %s1867_s12 }
  0x15   : > { %p190_p11 = scmp.eq.s32.totalorder %s189_s16, 0  ;;  %p1087_p13 = scmp.eq.s32.totalorder %s1037_s9, 0 }
  0x16   : > { %p1079_p12 = pneg %p217_p10  ;;  %s243_s19 = sshll.u32 %s1813_s6, 4  ;;  %s244_s19 = int_to_ptr.vmem [resolvable:$true] %s243_s19 }
  0x17   : > { %s1409_s20 = scalar_select %p190_p11, %s1266_s26, %s192_s13  }
  0x18   : > { %p1080_p0 = pnand %p1087_p13, %p1079_p12  ;;  %s1288_s21 = smov [#allocation3]  }
  0x19   : > { %264 = sbr.rel (%p217_p10) target bundleno = 1078 (0x436), region = 48 }
  0x1a   : > { %1082 = dma.vmem_to_smem (!%p1080_p0), %s244_s19, 32, %s1288_s21, [#allocation5]  }
  0x1e   : > { %1249 = dma.done.wait (%p1087_p13), [#allocation5], 32  }
  0x1f   : > { %1251 = vsyncadd (%p1087_p13), [#allocation5], 4294967264 }
  0x20   : > { %271 = sfence }
  0x21   : > { %s1815_s22 = sand.u32 1, %s1262_s25   ;;  %p298_p1 = scmp.lt.s32.totalorder %s1274_s28, 1 }
  0x22   : > { %s1415_s23 = sshll.u32 %s1815_s22, 3  ;;  %s1839_s0 = sld [smem:[#allocation9_spill]] }
  0x23   : > { %s299_s9 = scalar_select %p298_p1, %s1274_s28, 1 }
  0x24   : > { %p1047_p2 = scmp.ne.s32.totalorder %s1270_s27, 0 }
  0x25   : > { %s1071_s10 = sshll.u32 %s299_s9, 3 }
  0x26   : > { %306 = sbr.rel (%p1047_p2) target bundleno = 45 (0x2d), region = 56 }
  0x28   : > { %s1421_s17 = scalar_lea.vmem %s1839_s0, %s1071_s10 }
  0x2b   : > { %v307_v0 = vld [vmem:[%s1421_s17] sm:$0xff] }
  0x2c   : > { %308 = vst [vmem:[#allocation2] sm:$0xff] %v307_v0 }
  0x2d PF: > { %s1822_s19 = smov 16   ;;  %s1816_s21 = smov 15   ;;  %v1297_v40 = vmov 0   ;;  %vm512_vm0 = vcmask 908288   ;;  %vm434_vm1 = vcmask 1039360   ;;  %vm413_vm2 = vcmask 7168  }
  0x2e   : > { %s1826_s9 = smov 1   ;;  %s1820_s10 = smov 127   ;;  %1165 = vset.pattern.permute.xlu0 %v1297_v40  ;;  %1166 = vset.pattern.permute.xlu2 %v1297_v40  ;;  %vm560_vm3 = vcmask 1043456   ;;  %vm460_vm4 = vcmask 924672   ;;  %vm486_vm5 = vcmask 916480   ;;  %vm387_vm6 = vcmask 121856  }
  0x2f   : > { %s1824_s13 = smov 113   ;;  %s1828_s16 = smov 112   ;;  %vm361_vm7 = vcmask 130048   ;;  %vm336_vm8 = vcmask 138240   ;;  %vm574_vm9 = vcmask 293888  }
  0x30   : > { %s1830_s22 = smov 111   ;;  %s1818_s18 = smov 17  }
  0x31   : > { %s1840_s3 = sld [smem:[#allocation12_spill]]  ;;  %p1065_p4 = scmp.ne.s32.totalorder %s1270_s27, 1 }
  0x32   : > { %s1841_s1 = sld [smem:[#allocation10_spill]] }
  0x33   : > { %v1426_v1 = vld [vmem:[#allocation2] sm:$0xff]  ;;  %s1842_s2 = sld [smem:[#allocation11_spill]] }
  0x34   : > { %324 = vst [vmem:[#allocation1] ss:$2 sm:$0xff] %v1426_v1 }
  0x38   : > { %v1515_v43 = vld [vmem:[%s1841_s1 + $0x10] sm:$0x3]  ;;  %v1522_v48 = vld [vmem:[%s1841_s1 + $0xa] sm:$0x3]  ;;  %v1529_v51 = vld [vmem:[%s1841_s1 + $0x6] sm:$0x3] }
  0x39   : > { %v526_v46 = vperm.slane %v1515_v43, 1  ;;  %v1534_v52 = vld [vmem:[%s1841_s1 + $0xe] sm:$0x3]  ;;  %v448_v54 = vperm.slane %v1522_v48, 1  ;;  %v1548_v55 = vld [vmem:[%s1841_s1 + $0x4] sm:$0x3] }
  0x3a   : > { %v1554_v57 = vld [vmem:[%s1841_s1 + $0xc] sm:$0x3]  ;;  %v422_v58 = vperm.slane %v1529_v51, 1  ;;  %v500_v59 = vperm.slane %v1534_v52, 1 }
  0x3b   : > { %v1429_v2 = vld.sshfl [vmem:[#allocation1 + $0x8] sm:$0xff pattern:$0x75316420]  ;;  %v474_v63 = vperm.slane %v1554_v57, 1 }
  0x3c   : > { %329 = vst [vmem:[#allocation1] ss:$2 sm:$0xff] %v1426_v1 }
  0x43   : > { %v1432_v3 = vld.sshfl [vmem:[#allocation1] sm:$0xff pattern:$0x75316420]  ;;  %v1434_v4 = vld.sshfl [vmem:[#allocation1 + $0x8] sm:$0xff pattern:$0x75316420] }
  0x44   : > { %349 = vst [vmem:[#allocation1] ss:$2 sm:$0xff] %v1426_v1 }
  0x4b   : > { %v350_v5 = vld.sshfl [vmem:[#allocation1 + $0x8] sm:$0xff pattern:$0x75316420] }
  0x4c   : > { %351 = vrot.lane.b32.xlu0 %v350_v5, %s1822_s19  ;;  %354 = vst [vmem:[#allocation1] ss:$2 sm:$0xff] %v1426_v1  ;;  %v499_v5 = vperm.slane %v1534_v52, 0 }
  0x53   : > { %v355_v6 = vld.sshfl [vmem:[#allocation1] sm:$0xff pattern:$0x75316420]  ;;  %v356_v7 = vld.sshfl [vmem:[#allocation1 + $0x8] sm:$0xff pattern:$0x75316420] }
  0x54   : > { %357 = vrot.lane.b32.xlu1 %v355_v6, %s1822_s19  ;;  %375 = vst [vmem:[#allocation1] ss:$2 sm:$0xff] %v1426_v1  ;;  %359 = vrot.lane.b32.xlu2 %v356_v7, %s1822_s19 }
  0x5b   : > { %v376_v8 = vld.sshfl [vmem:[#allocation1 + $0x8] sm:$0xff pattern:$0x75316420] }
  0x5c   : > { %377 = vrot.lane.b32.xlu0 %v376_v8, %s1816_s21  ;;  %380 = vst [vmem:[#allocation1] ss:$2 sm:$0xff] %v1426_v1 }
  0x63   : > { %v381_v9 = vld.sshfl [vmem:[#allocation1] sm:$0xff pattern:$0x75316420]  ;;  %v382_v10 = vld.sshfl [vmem:[#allocation1 + $0x8] sm:$0xff pattern:$0x75316420] }
  0x64   : > { %383 = vrot.lane.b32.xlu1 %v381_v9, %s1816_s21  ;;  %401 = vst [vmem:[#allocation1] ss:$2 sm:$0xff] %v1426_v1  ;;  %385 = vrot.lane.b32.xlu2 %v382_v10, %s1816_s21  ;;  %s1493_s21 = sshll.u32 %s1270_s27, 3 }
  0x65   : > { %s1499_s19 = scalar_lea.vmem %s1840_s3, %s1493_s21  ;;  %s1542_s3 = scalar_lea.vmem %s1812_s5, %s1493_s21 }
  0x66   : > { %v315_v41 = vld [vmem:[%s1499_s19] sm:$0xf]  ;;  %s1642_s0 = scalar_lea.vmem %s1842_s2, %s1493_s21  ;;  %s1850_s2 = smov 15  }
  0x67   : > { %v321_v60 = vld [vmem:[%s1542_s3] sm:$0xf] }
  0x6b   : > { %v402_v11 = vld.sshfl [vmem:[#allocation1 + $0x8] sm:$0xff pattern:$0x75316420] }
  0x6c   : > { %403 = vrot.lane.b32.xlu0 %v402_v11, %s1826_s9  ;;  %406 = vst [vmem:[#allocation1] ss:$2 sm:$0xff] %v1426_v1  ;;  %v447_v11 = vperm.slane %v1522_v48, 0 }
  0x73   : > { %v407_v12 = vld.sshfl [vmem:[#allocation1] sm:$0xff pattern:$0x75316420]  ;;  %v408_v13 = vld.sshfl [vmem:[#allocation1 + $0x8] sm:$0xff pattern:$0x75316420] }
  0x74   : > { %409 = vrot.lane.b32.xlu1 %v407_v12, %s1826_s9  ;;  %427 = vst [vmem:[#allocation1] ss:$2 sm:$0xff] %v1426_v1  ;;  %411 = vrot.lane.b32.xlu2 %v408_v13, %s1826_s9  ;;  %s1844_s9 = smov 112  }
  0x7b   : > { %v428_v14 = vld.sshfl [vmem:[#allocation1] sm:$0xff pattern:$0x75316420]  ;;  %v429_v15 = vld.sshfl [vmem:[#allocation1 + $0x8] sm:$0xff pattern:$0x75316420] }
  0x7c   : > { %430 = vrot.lane.b32.xlu0 %v428_v14, %s1820_s10  ;;  %432 = vrot.lane.b32.xlu1 %v429_v15, %s1820_s10  ;;  %438 = vst [vmem:[#allocation1] ss:$2 sm:$0xff] %v1426_v1 }
  0x83   : > { %v439_v16 = vld.sshfl [vmem:[#allocation1] sm:$0xff pattern:$0x75316420] }
  0x84   : > { %453 = vst [vmem:[#allocation1] ss:$2 sm:$0xff] %v1426_v1  ;;  %440 = vrot.lane.b32.xlu2 %v439_v16, %s1820_s10  ;;  %v1583_v16 = vld [vmem:[%s1841_s1 + $0x2] sm:$0x3] }
  0x8b   : > { %v454_v17 = vld.sshfl [vmem:[#allocation1] sm:$0xff pattern:$0x75316420]  ;;  %v455_v18 = vld.sshfl [vmem:[#allocation1 + $0x8] sm:$0xff pattern:$0x75316420] }
  0x8c   : > { %456 = vrot.lane.b32.xlu0 %v454_v17, %s1824_s13  ;;  %458 = vrot.lane.b32.xlu1 %v455_v18, %s1824_s13  ;;  %464 = vst [vmem:[#allocation1] ss:$2 sm:$0xff] %v1426_v1  ;;  %v421_v18 = vperm.slane %v1529_v51, 0 }
  0x93   : > { %v465_v19 = vld.sshfl [vmem:[#allocation1] sm:$0xff pattern:$0x75316420] }
  0x94   : > { %479 = vst [vmem:[#allocation1] ss:$2 sm:$0xff] %v1426_v1  ;;  %466 = vrot.lane.b32.xlu2 %v465_v19, %s1824_s13  ;;  %s1845_s13 = smov 1  }
  0x9b   : > { %v480_v20 = vld.sshfl [vmem:[#allocation1] sm:$0xff pattern:$0x75316420]  ;;  %v481_v21 = vld.sshfl [vmem:[#allocation1 + $0x8] sm:$0xff pattern:$0x75316420] }
  0x9c   : > { %482 = vrot.lane.b32.xlu0 %v480_v20, %s1828_s16  ;;  %490 = vst [vmem:[#allocation1] ss:$2 sm:$0xff] %v1426_v1 }
  0xa3   : > { %v491_v22 = vld.sshfl [vmem:[#allocation1] sm:$0xff pattern:$0x75316420] }
  0xa4   : > { %484 = vrot.lane.b32.xlu0 %v481_v21, %s1828_s16  ;;  %492 = vrot.lane.b32.xlu1 %v491_v22, %s1828_s16  ;;  %505 = vst [vmem:[#allocation1] ss:$2 sm:$0xff] %v1426_v1  ;;  %s1510_s16 = scalar_lea.vmem %s1811_s4, %s1493_s21  ;;  %s1832_s21 = sshll.u32 %s1270_s27, 7 }
  0xa5   : > { %v318_v45 = vld [vmem:[%s1510_s16] sm:$0xf]  ;;  %s625_s10 = sld [smem:[#allocation3 + %s1832_s21]]  ;;  %s1848_s21 = smov 127  }
  0xab   : > { %v506_v23 = vld.sshfl [vmem:[#allocation1] sm:$0xff pattern:$0x75316420]  ;;  %v507_v24 = vld.sshfl [vmem:[#allocation1 + $0x8] sm:$0xff pattern:$0x75316420] }
  0xac   : > { %508 = vrot.lane.b32.xlu1 %v506_v23, %s1830_s22  ;;  %326 = vrot.lane.b32.xlu0 %v1429_v2, %s1818_s18  ;;  %516 = vst [vmem:[#allocation1] ss:$2 sm:$0xff] %v1426_v1 }
  0xad   : > { %510 = vrot.lane.b32.xlu2 %v507_v24, %s1830_s22  ;;  %v525_v24 = vperm.slane %v1515_v43, 0 }
  0xae   : > { %v1478_v26 = vpop.permute.xlu2 %359 }
  0xb3   : > { %v517_v25 = vld.sshfl [vmem:[#allocation1] sm:$0xff pattern:$0x75316420] }
  0xb4   : > { %332 = vrot.lane.b32.xlu1 %v1432_v3, %s1818_s18  ;;  %543 = vst [vmem:[#allocation1] ss:$2 sm:$0xff] %v1426_v1  ;;  %571 = vperm.xlu0 %1165, %v315_v41   ;;  %v396_v3 = vperm.slane %v1548_v55, 1 }
  0xb5   : > { %518 = vrot.lane.b32.xlu2 %v517_v25, %s1830_s22  ;;  %s1843_s22 = smov 111  }
  0xbb   : > { %v545_v20 = vld.sshfl [vmem:[#allocation1 + $0x8] sm:$0xff pattern:$0x75316420] }
  0xbc   : > { %673 = vperm.xlu0 %1165, %v318_v45  }
  0xbd   : > { %334 = vrot.lane.b32.xlu2 %v1434_v4, %s1818_s18  ;;  %s1846_s18 = smov 113  }
  0xbe   : > { %v1480_v27 = vpop.permute.xlu0 %351  ;;  %v386_v28 = vpop.permute.xlu2 %385 }
  0xc4   : > { %680 = vperm.xlu0 %1165, %v321_v60  }
  0xc6   : > { %v1482_v29 = vpop.permute.xlu1 %357 }
  0xc7   : > { %v365_v45 = vsel %vm361_vm7, %v1480_v27, %v1482_v29  ;;  %v1625_v27 = vld [vmem:[%s1841_s1] sm:$0x3]  ;;  %s1849_s1 = smov 17  }
  0xce   : > { %v1484_v30 = vpop.permute.xlu0 %377  ;;  %v412_v31 = vpop.permute.xlu2 %411 }
  0xd6   : > { %v1486_v32 = vpop.permute.xlu1 %383 }
  0xd7   : > { %v388_v7 = vsel %vm387_vm6, %v1486_v32, %v386_v28  ;;  %v473_v28 = vperm.slane %v1554_v57, 0 }
  0xd8   : > { %v400_v17 = vmul.f32 %v396_v3, %v388_v7 }
  0xde   : > { %v1488_v33 = vpop.permute.xlu0 %403  ;;  %v441_v34 = vpop.permute.xlu2 %440 }
  0xe6   : > { %v1490_v35 = vpop.permute.xlu1 %409 }
  0xe7   : > { %v414_v61 = vsel %vm413_vm2, %v1490_v35, %v412_v31  ;;  %v417_v21 = vsel %vm413_vm2, %v1488_v33, %v1490_v35  ;;  %v369_v31 = vperm.slane %v1583_v16, 0 }
  0xe8   : > { %v426_v8 = vmul.f32 %v422_v58, %v414_v61  ;;  %v343_v61 = vperm.slane %v1625_v27, 0 }
  0xea   : > { %v540_v22 = vrot.slane %v426_v8, 4 }
  0xee   : > { %v431_v36 = vpop.permute.xlu0 %430  ;;  %v467_v37 = vpop.permute.xlu2 %466 }
  0xef   : > { %v433_v38 = vpop.permute.xlu1 %432 }
  0xf0   : > { %v443_v56 = vsel %vm434_vm1, %v433_v38, %v441_v34  ;;  %v435_v12 = vsel %vm434_vm1, %v431_v36, %v433_v38  ;;  %v370_v34 = vperm.slane %v1583_v16, 1  ;;  %v425_v38 = vmul.f32 %v421_v18, %v417_v21 }
  0xf1   : > { %v452_v62 = vmul.f32 %v448_v54, %v443_v56  ;;  %v451_v25 = vmul.f32 %v447_v11, %v435_v12  ;;  %v628_v21 = vstv %s625_s10  ;;  %s1847_s10 = smov 16  }
  0xf3   : > { %v551_v13 = vrot.slane %v452_v62, 4  ;;  %v344_v62 = vperm.slane %v1625_v27, 1 }
  0xf5   : > { %v566_v35 = vsel %vm560_vm3, %v545_v20, %v551_v13 }
  0xfe   : > { %v1501_v39 = vpop.permute.xlu0 %456  ;;  %v459_v44 = vpop.permute.xlu1 %458 }
  0xff   : > { %v469_v4 = vsel %vm460_vm4, %v459_v44, %v467_v37  ;;  %v461_v36 = vsel %vm460_vm4, %v1501_v39, %v459_v44  ;;  %v395_v37 = vperm.slane %v1548_v55, 0  ;;  %v391_v39 = vsel %vm387_vm6, %v1484_v30, %v1486_v32  ;;  %v544_v30 = vld.sshfl [vmem:[#allocation1] sm:$0xff pattern:$0x75316420] }
 0x100   : > { %v478_v14 = vmul.f32 %v474_v63, %v469_v4  ;;  %v564_v44 = vsel %vm560_vm3, %v400_v17, %v540_v22  ;;  %v373_v32 = vmul.f32 %v369_v31, %v365_v45 }
 0x107   : > { %v1504_v42 = vpop.permute.xlu2 %510 }
 0x10e   : > { %v483_v47 = vpop.permute.xlu0 %482 }
 0x10f   : > { %v519_v49 = vpop.permute.xlu2 %518 }
 0x110   : > { %v521_v50 = vsel %vm512_vm0, %v1504_v42, %v519_v49  ;;  %v362_v49 = vsel %vm361_vm7, %v1482_v29, %v1478_v26  ;;  %v399_v26 = vmul.f32 %v395_v37, %v391_v39  ;;  %v539_v29 = vrot.slane %v425_v38, 4 }
 0x111   : > { %v530_v53 = vmul.f32 %v526_v46, %v521_v50  ;;  %v550_v50 = vrot.slane %v451_v25, 4  ;;  %v374_v56 = vmul.f32 %v370_v34, %v362_v49 }
 0x112   : > { %v563_v8 = vsel %vm560_vm3, %v399_v26, %v539_v29 }
 0x113   : > { %1058 = vmatpush.msk.msra.mxu1 %vm560_vm3, %v530_v53 }
 0x116   : > { %v485_v0 = vpop.permute.xlu0 %484  ;;  %v493_v2 = vpop.permute.xlu1 %492 }
 0x117   : > { %v495_v6 = vsel %vm486_vm5, %v485_v0, %v493_v2  ;;  %v487_v9 = vsel %vm486_vm5, %v483_v47, %v485_v0  ;;  %v335_v0 = vpop.permute.xlu2 %334  ;;  %v565_v2 = vsel %vm560_vm3, %v544_v30, %v550_v50 }
 0x118   : > { %v504_v10 = vmul.f32 %v500_v59, %v495_v6  ;;  %v503_v19 = vmul.f32 %v499_v5, %v487_v9  ;;  %v533_v9 = vrot.slane %v373_v32, 4 }
 0x11a   : > { %v557_v15 = vrot.slane %v504_v10, 4  ;;  %v556_v40 = vrot.slane %v503_v19, 4  ;;  %v534_v10 = vrot.slane %v374_v56, 4 }
 0x11c   : > { %v568_v23 = vsel %vm560_vm3, %v478_v14, %v557_v15  ;;  %v312_v14 = vld [vmem:[%s1642_s0] sm:$0xf] }
 0x11d   : > { %616 = vmatpush.msra.mxu1 %v568_v23 }
 0x11e   : > { %v509_v33 = vpop.permute.xlu1 %508  ;;  %v327_v60 = vpop.permute.xlu0 %326 }
 0x11f   : > { %v513_v41 = vsel %vm512_vm0, %v509_v33, %v1504_v42  ;;  %617 = vmatpush.msra.mxu1 %v566_v35  ;;  %v477_v42 = vmul.f32 %v473_v28, %v461_v36 }
 0x120   : > { %v529_v47 = vmul.f32 %v525_v24, %v513_v41 }
 0x121   : > { %618 = vmatpush.msra.mxu1 %v564_v44  ;;  %v567_v53 = vsel %vm560_vm3, %v477_v42, %v556_v40  ;;  %v1298_v42 = vmov 256.0  }
 0x122   : > { %1056 = vmatpush.msk.msra.mxu0 %vm560_vm3, %v529_v47  ;;  %1167 = vrcp.f32 %v1298_v42 }
 0x124   : > { %596 = vmatpush.msra.mxu0 %v567_v53 }
 0x126   : > { %v333_v4 = vpop.permute.xlu1 %332  ;;  %597 = vmatpush.msra.mxu0 %v565_v2  ;;  %v572_v19 = vpop.permute.xlu0 %571 }
 0x127   : > { %v340_v6 = vsel %vm336_vm8, %v327_v60, %v333_v4  ;;  %v337_v7 = vsel %vm336_vm8, %v333_v4, %v335_v0 }
 0x128   : > { %v347_v12 = vmul.f32 %v343_v61, %v340_v6  ;;  %v348_v13 = vmul.f32 %v344_v62, %v337_v7  ;;  %598 = vmatpush.msra.mxu0 %v563_v8  ;;  %v1168_v30 = vpop.eup %1167 }
 0x129   : > { %v639_v32 = vmul.f32 256.0, %v1168_v30  ;;  %vm643_vm12 = vweird.f32 %v1168_v30 }
 0x12a   : > { %v561_v15 = vsel %vm560_vm3, %v347_v12, %v533_v9  ;;  %v562_v17 = vsel %vm560_vm3, %v348_v13, %v534_v10 }
 0x12b   : > { %599 = vmatpush.msra.mxu0 %v561_v15  ;;  %619 = vmatpush.msra.mxu1 %v562_v17  ;;  %v640_v26 = vsub.f32 1.0, %v639_v32 }
 0x12c   : > { %1057 = vmatmul.msk.f32.vlgmr.msra.gmra.mxu0 %vm574_vm9, %v312_v14  ;;  %1059 = vmatmul.msk.f32.vlgmr.msra.gmra.mxu1 %vm574_vm9, %v312_v14 }
 0x12d   : > { %v641_v29 = vmul.f32 %v1168_v30, %v640_v26 }
 0x12e   : > { %v674_v13 = vpop.permute.xlu0 %673 }
 0x12f   : > { %v642_v53 = vadd.f32 %v1168_v30, %v641_v29 }
 0x131   : > { %v1663_v56 = vsel %vm643_vm12, %v1168_v30, %v642_v53 }
 0x1a9   : > { %v601_v20 = vpop.f32.mrf.mxu0  ;;  %v621_v22 = vpop.f32.mrf.mxu1 }
 0x1aa   : > { %v602_v23 = vadd.f32 %v601_v20, %v572_v19  ;;  %v622_v25 = vadd.f32 %v621_v22, %v572_v19 }
 0x1ac   : > { %vm626_vm10 = vcmp.ge.f32.partialorder %v602_v23, 0.0  ;;  %v629_v36 = vmul.f32 %v628_v21, %v602_v23  ;;  %vm627_vm11 = vcmp.ge.f32.partialorder %v622_v25, 0.0  ;;  %v630_v33 = vmul.f32 %v628_v21, %v622_v25 }
 0x1ae   : > { %v631_v35 = vsel %vm626_vm10, %v602_v23, %v629_v36  ;;  %v632_v38 = vsel %vm627_vm11, %v622_v25, %v630_v33  ;;  %v681_v33 = vpop.permute.xlu0 %680 }
 0x1af   : > { %v633_v40 = vsel %vm560_vm3, %v631_v35, 0.0  ;;  %v634_v41 = vsel %vm560_vm3, %v632_v38, 0.0  ;;  %v646_v45 = vmul.f32 %v631_v35, %v631_v35  ;;  %v647_v39 = vmul.f32 %v632_v38, %v632_v38 }
 0x1b0   : > { %v635_v44 = vadd.f32 %v634_v41, %v633_v40 }
 0x1b1   : > { %v648_v47 = vsel %vm560_vm3, %v646_v45, 0.0  ;;  %v649_v49 = vsel %vm560_vm3, %v647_v39, 0.0 }
 0x1b2   : > { %636 = vadd.xlane.f32.xlu1 %v635_v44  ;;  %v650_v50 = vadd.f32 %v649_v49, %v648_v47 }
 0x1b4   : > { %651 = vadd.xlane.f32.xlu2 %v650_v50 }
 0x225   : > { %v637_v60 = vpop.xlane.xlu1 %636 }
 0x226   : > { %v645_v0 = vmul.f32 %v1663_v56, %v637_v60 }
 0x227   : > { %v652_v2 = vpop.xlane.xlu2 %651 }
 0x228   : > { %v653_v4 = vmul.f32 %v652_v2, %v1663_v56  ;;  %v654_v6 = vmul.f32 %v645_v0, %v645_v0  ;;  %v656_v19 = vsub.f32 %v631_v35, %v645_v0  ;;  %v657_v20 = vsub.f32 %v632_v38, %v645_v0  ;;  %v316_v2 = vld [vmem:[%s1499_s19 + $0x4] sm:$0xf]  ;;  %s1852_s19 = scalar_lea.vmem (!%p1065_p4), [#allocation6], %s1415_s23 }
 0x22a   : > { %v655_v7 = vsub.f32 %v653_v4, %v654_v6 }
 0x22c   : > { %v658_v8 = vadd.f32 1e-05, %v655_v7 }
 0x22e   : > { %1169 = vrsqrt.f32 %v658_v8  ;;  %vm665_vm14 = vweird.f32 %v658_v8 }
 0x234   : > { %v1170_v9 = vpop.eup %1169 }
 0x235   : > { %v660_v10 = vmul.f32 %v1170_v9, %v658_v8  ;;  %vm666_vm13 = vweird.f32 %v1170_v9 }
 0x236   : > { %vm667_vm15 = vmor %vm665_vm14, %vm666_vm13 }
 0x237   : > { %v661_v12 = vmul.f32 %v1170_v9, %v660_v10 }
 0x239   : > { %v662_v14 = vmul.f32 0.5, %v661_v12  ;;  %v319_v12 = vld [vmem:[%s1510_s16 + $0x4] sm:$0xf] }
 0x23b   : > { %v663_v15 = vsub.f32 1.5, %v662_v14 }
 0x23d   : > { %v664_v17 = vmul.f32 %v1170_v9, %v663_v15 }
 0x23f   : > { %v668_v21 = vsel %vm667_vm15, %v1170_v9, %v664_v17  ;;  %v322_v17 = vld [vmem:[%s1542_s3 + $0x4] sm:$0xf] }
 0x240   : > { %v669_v22 = vmul.f32 %v668_v21, %v656_v19  ;;  %v670_v23 = vmul.f32 %v668_v21, %v657_v20 }
 0x242   : > { %v676_v25 = vmul.f32 %v674_v13, %v669_v22  ;;  %v677_v36 = vmul.f32 %v674_v13, %v670_v23 }
 0x244   : > { %v683_v40 = vadd.f32 %v681_v33, %v676_v25  ;;  %v684_v41 = vadd.f32 %v681_v33, %v677_v36 }
 0x246   : > { %766 = vrot.lane.b32.xlu1 %v684_v41, %s1843_s22  ;;  %764 = vrot.lane.b32.xlu2 %v683_v40, %s1843_s22 }
 0x247   : > { %753 = vrot.lane.b32.xlu0 %v683_v40, %s1844_s9 }
 0x24e   : > { %720 = vrot.lane.b32.xlu1 %v684_v41, %s1845_s13  ;;  %744 = vrot.lane.b32.xlu2 %v684_v41, %s1846_s18 }
 0x24f   : > { %755 = vrot.lane.b32.xlu0 %v684_v41, %s1844_s9 }
 0x256   : > { %701 = vrot.lane.b32.xlu1 %v683_v40, %s1847_s10  ;;  %698 = vrot.lane.b32.xlu2 %v684_v41, %s1847_s10 }
 0x257   : > { %731 = vrot.lane.b32.xlu0 %v683_v40, %s1848_s21 }
 0x25e   : > { %686 = vrot.lane.b32.xlu1 %v684_v41, %s1849_s1  ;;  %712 = vrot.lane.b32.xlu2 %v683_v40, %s1850_s2 }
 0x25f   : > { %733 = vrot.lane.b32.xlu0 %v684_v41, %s1848_s21 }
 0x266   : > { %809 = vperm.xlu2 %1166, %v316_v2  }
 0x267   : > { %742 = vrot.lane.b32.xlu0 %v683_v40, %s1846_s18 }
 0x26e   : > { %903 = vperm.xlu2 %1166, %v319_v12  }
 0x26f   : > { %723 = vrot.lane.b32.xlu0 %v683_v40, %s1845_s13 }
 0x276   : > { %910 = vperm.xlu2 %1166, %v322_v17  }
 0x277   : > { %709 = vrot.lane.b32.xlu0 %v684_v41, %s1850_s2 }
 0x27f   : > { %690 = vrot.lane.b32.xlu0 %v683_v40, %s1849_s1  ;;  %s1851_s1 = sshll.u32 %s1270_s27, 7 }
 0x280   : > { %s861_s2 = sadd.s32 1, %s1851_s1 }
 0x281   : > { %s862_s3 = sld [smem:[#allocation3 + %s861_s2]] }
 0x2a0   : > { %v765_v35 = vpop.permute.xlu2 %764 }
 0x2b8   : > { %v767_v38 = vpop.permute.xlu1 %766 }
 0x2b9   : > { %v768_v45 = vsel %vm512_vm0, %v765_v35, %v767_v38  ;;  %v772_v39 = vsel %vm512_vm0, %v767_v38, %v765_v35  ;;  %v754_v44 = vpop.permute.xlu0 %753 }
 0x2ba   : > { %v773_v47 = vmul.f32 %v768_v45, %v525_v24  ;;  %v774_v49 = vmul.f32 %v772_v39, %v526_v46  ;;  %v745_v24 = vpop.permute.xlu2 %744 }
 0x2bc   : > { %1061 = vmatpush.msk.msra.mxu2 %vm560_vm3, %v773_v47  ;;  %1063 = vmatpush.msk.msra.mxu3 %vm560_vm3, %v774_v49 }
 0x2c0   : > { %v721_v48 = vpop.permute.xlu1 %720 }
 0x2c1   : > { %v756_v50 = vpop.permute.xlu0 %755 }
 0x2c2   : > { %v757_v32 = vsel %vm486_vm5, %v754_v44, %v756_v50  ;;  %v761_v26 = vsel %vm486_vm5, %v756_v50, %v754_v44  ;;  %v699_v13 = vpop.permute.xlu2 %698 }
 0x2c3   : > { %v762_v43 = vmul.f32 %v757_v32, %v499_v5  ;;  %v763_v46 = vmul.f32 %v761_v26, %v500_v59 }
 0x2c5   : > { %v795_v6 = vrot.slane %v762_v43, 4  ;;  %v796_v7 = vrot.slane %v763_v46, 4 }
 0x2c8   : > { %v702_v19 = vpop.permute.xlu1 %701 }
 0x2c9   : > { %v732_v42 = vpop.permute.xlu0 %731  ;;  %v706_v51 = vsel %vm361_vm7, %v699_v13, %v702_v19 }
 0x2ca   : > { %v713_v22 = vpop.permute.xlu2 %712  ;;  %v707_v45 = vmul.f32 %v706_v51, %v369_v31 }
 0x2cc   : > { %v777_v47 = vrot.slane %v707_v45, 4 }
 0x2d0   : > { %v687_v55 = vpop.permute.xlu1 %686 }
 0x2d1   : > { %v734_v30 = vpop.permute.xlu0 %733 }
 0x2d2   : > { %v735_v29 = vsel %vm434_vm1, %v732_v42, %v734_v30  ;;  %v739_v53 = vsel %vm434_vm1, %v734_v30, %v732_v42  ;;  %v313_v30 = vld [vmem:[%s1642_s0 + $0x4] sm:$0xf] }
 0x2d3   : > { %v740_v60 = vmul.f32 %v735_v29, %v447_v11  ;;  %v741_v0 = vmul.f32 %v739_v53, %v448_v54 }
 0x2d5   : > { %v789_v5 = vrot.slane %v740_v60, 4  ;;  %v790_v10 = vrot.slane %v741_v0, 4 }
 0x2d7   : > { %v803_v14 = vsel %vm560_vm3, %v683_v40, %v789_v5  ;;  %v804_v15 = vsel %vm560_vm3, %v684_v41, %v790_v10 }
 0x2d9   : > { %v743_v4 = vpop.permute.xlu0 %742 }
 0x2da   : > { %v746_v8 = vsel %vm460_vm4, %v743_v4, %v745_v24  ;;  %v750_v9 = vsel %vm460_vm4, %v745_v24, %v743_v4 }
 0x2db   : > { %v751_v52 = vmul.f32 %v746_v8, %v473_v28  ;;  %v752_v59 = vmul.f32 %v750_v9, %v474_v63 }
 0x2dd   : > { %v805_v54 = vsel %vm560_vm3, %v751_v52, %v795_v6  ;;  %v806_v11 = vsel %vm560_vm3, %v752_v59, %v796_v7 }
 0x2de   : > { %833 = vmatpush.msra.mxu2 %v805_v54  ;;  %853 = vmatpush.msra.mxu3 %v806_v11 }
 0x2e0   : > { %834 = vmatpush.msra.mxu2 %v803_v14  ;;  %854 = vmatpush.msra.mxu3 %v804_v15 }
 0x2e1   : > { %v724_v28 = vpop.permute.xlu0 %723 }
 0x2e2   : > { %v725_v57 = vsel %vm413_vm2, %v724_v28, %v721_v48  ;;  %v728_v63 = vsel %vm413_vm2, %v721_v48, %v724_v28 }
 0x2e3   : > { %v729_v20 = vmul.f32 %v728_v63, %v421_v18  ;;  %v730_v21 = vmul.f32 %v725_v57, %v422_v58  ;;  %v703_v18 = vsel %vm361_vm7, %v702_v19, %v699_v13 }
 0x2e5   : > { %v783_v33 = vrot.slane %v729_v20, 4  ;;  %v784_v40 = vrot.slane %v730_v21, 4 }
 0x2e9   : > { %v710_v23 = vpop.permute.xlu0 %709 }
 0x2ea   : > { %v714_v25 = vsel %vm387_vm6, %v713_v22, %v710_v23  ;;  %v717_v36 = vsel %vm387_vm6, %v710_v23, %v713_v22 }
 0x2eb   : > { %v718_v41 = vmul.f32 %v717_v36, %v395_v37  ;;  %v719_v35 = vmul.f32 %v714_v25, %v396_v3  ;;  %v708_v37 = vmul.f32 %v703_v18, %v370_v34  ;;  %v810_v34 = vpop.permute.xlu2 %809 }
 0x2ed   : > { %v801_v58 = vsel %vm560_vm3, %v718_v41, %v783_v33  ;;  %v802_v38 = vsel %vm560_vm3, %v719_v35, %v784_v40  ;;  %v778_v49 = vrot.slane %v708_v37, 4 }
 0x2ee   : > { %835 = vmatpush.msra.mxu2 %v801_v58  ;;  %855 = vmatpush.msra.mxu3 %v802_v38 }
 0x2f1   : > { %v691_v3 = vpop.permute.xlu0 %690 }
 0x2f2   : > { %v692_v39 = vsel %vm336_vm8, %v691_v3, %v687_v55  ;;  %v695_v44 = vsel %vm336_vm8, %v687_v55, %v691_v3 }
 0x2f3   : > { %v696_v50 = vmul.f32 %v695_v44, %v343_v61  ;;  %v697_v42 = vmul.f32 %v692_v39, %v344_v62  ;;  %v865_v61 = vstv %s862_s3  ;;  %v904_v14 = vpop.permute.xlu2 %903 }
 0x2f5   : > { %v799_v31 = vsel %vm560_vm3, %v696_v50, %v777_v47  ;;  %v800_v16 = vsel %vm560_vm3, %v697_v42, %v778_v49 }
 0x2f6   : > { %836 = vmatpush.msra.mxu2 %v799_v31  ;;  %856 = vmatpush.msra.mxu3 %v800_v16 }
 0x2f7   : > { %1062 = vmatmul.msk.f32.vlgmr.msra.gmra.mxu2 %vm574_vm9, %v313_v30  ;;  %1064 = vmatmul.msk.f32.vlgmr.msra.gmra.mxu3 %vm574_vm9, %v313_v30 }
 0x2fb   : > { %v911_v23 = vpop.permute.xlu2 %910 }
 0x37a   : > { %v838_v32 = vpop.f32.mrf.mxu2  ;;  %v858_v26 = vpop.f32.mrf.mxu3 }
 0x37b   : > { %v839_v27 = vadd.f32 %v838_v32, %v810_v34  ;;  %v859_v62 = vadd.f32 %v858_v26, %v810_v34 }
 0x37d   : > { %vm863_vm0 = vcmp.ge.f32.partialorder %v839_v27, 0.0  ;;  %v866_v29 = vmul.f32 %v865_v61, %v839_v27  ;;  %vm864_vm1 = vcmp.ge.f32.partialorder %v859_v62, 0.0  ;;  %v867_v53 = vmul.f32 %v865_v61, %v859_v62 }
 0x37f   : > { %v868_v24 = vsel %vm863_vm0, %v839_v27, %v866_v29  ;;  %v869_v43 = vsel %vm864_vm1, %v859_v62, %v867_v53 }
 0x380   : > { %v870_v46 = vsel %vm560_vm3, %v868_v24, 0.0  ;;  %v871_v60 = vsel %vm560_vm3, %v869_v43, 0.0  ;;  %v876_v0 = vmul.f32 %v868_v24, %v868_v24  ;;  %v877_v2 = vmul.f32 %v869_v43, %v869_v43 }
 0x381   : > { %v872_v4 = vadd.f32 %v871_v60, %v870_v46 }
 0x382   : > { %v878_v6 = vsel %vm560_vm3, %v876_v0, 0.0  ;;  %v879_v7 = vsel %vm560_vm3, %v877_v2, 0.0 }
 0x383   : > { %873 = vadd.xlane.f32.xlu1 %v872_v4  ;;  %v880_v8 = vadd.f32 %v879_v7, %v878_v6 }
 0x385   : > { %881 = vadd.xlane.f32.xlu0 %v880_v8 }
 0x3f6   : > { %v874_v9 = vpop.xlane.xlu1 %873 }
 0x3f7   : > { %v875_v5 = vmul.f32 %v874_v9, %v1663_v56 }
 0x3f8   : > { %v882_v10 = vpop.xlane.xlu0 %881 }
 0x3f9   : > { %v883_v52 = vmul.f32 %v882_v10, %v1663_v56  ;;  %v884_v59 = vmul.f32 %v875_v5, %v875_v5  ;;  %v886_v63 = vsub.f32 %v868_v24, %v875_v5  ;;  %v887_v17 = vsub.f32 %v869_v43, %v875_v5 }
 0x3fb   : > { %v885_v48 = vsub.f32 %v883_v52, %v884_v59 }
 0x3fd   : > { %v888_v54 = vadd.f32 1e-05, %v885_v48 }
 0x3ff   : > { %1171 = vrsqrt.f32 %v888_v54  ;;  %vm895_vm4 = vweird.f32 %v888_v54 }
 0x405   : > { %v1172_v11 = vpop.eup %1171 }
 0x406   : > { %v890_v12 = vmul.f32 %v1172_v11, %v888_v54  ;;  %vm896_vm2 = vweird.f32 %v1172_v11 }
 0x407   : > { %vm897_vm5 = vmor %vm895_vm4, %vm896_vm2 }
 0x408   : > { %v891_v13 = vmul.f32 %v1172_v11, %v890_v12 }
 0x40a   : > { %v892_v15 = vmul.f32 0.5, %v891_v13 }
 0x40c   : > { %v893_v28 = vsub.f32 1.5, %v892_v15 }
 0x40e   : > { %v894_v57 = vmul.f32 %v1172_v11, %v893_v28 }
 0x410   : > { %v898_v19 = vsel %vm897_vm5, %v1172_v11, %v894_v57 }
 0x411   : > { %v899_v20 = vmul.f32 %v898_v19, %v886_v63  ;;  %v900_v21 = vmul.f32 %v898_v19, %v887_v17 }
 0x413   : > { %v906_v56 = vmul.f32 %v904_v14, %v899_v20  ;;  %v907_v22 = vmul.f32 %v904_v14, %v900_v21 }
 0x415   : > { %v914_v25 = vadd.f32 %v911_v23, %v907_v22  ;;  %v913_v36 = vadd.f32 %v911_v23, %v906_v56 }
 0x417   : > { %v917_v33 = vrot.slane %v914_v25, 4 }
 0x418   : > { %925 = sbr.rel (%p1065_p4) target bundleno = 1063 (0x427), region = 60 }
 0x419   : > { %v918_v40 = vsel %vm560_vm3, %v913_v36, %v917_v33 }
 0x41a   : > { %v920_v41 = vadd.f32 %v918_v40, %v1426_v1 }
 0x41c   : > { %921 = vst [vmem:[#allocation2] sm:$0xff] %v920_v41 }
 0x41d   : > { %v926_v35 = vld [vmem:[%s1421_s17] sm:$0xff] }
 0x423   : > { %v927_v18 = vld [vmem:[#allocation2] sm:$0xff] }
 0x424   : > { %v928_v51 = vadd.f32 %v927_v18, %v926_v35 }
 0x426   : > { %929 = vst [vmem:[%s1852_s19] sm:$0xff] %v928_v51 }
 0x427 PF: > { %s1072_s16 = sshll.u32 %s1274_s28, 3  ;;  %s1853_s9 = scalar_lea.vmem [#allocation6], %s1415_s23 }
 0x428   : > { %s942_s22 = scalar_lea.hbm %s1814_s7, %s1072_s16  ;;  %s944_s27 = sshll.u32 %s1853_s9, 4  ;;  %s945_s27 = int_to_ptr.vmem [resolvable:$true] %s944_s27 }
 0x429   : > { %s946_s13 = sshll.u32 %s942_s22, 4  ;;  %s1854_s17 = sand.u32 1, %s1262_s25   ;;  %s947_s13 = int_to_ptr.hbm [resolvable:$true] %s946_s13 }
 0x42a   : > { %s931_s18 = scalar_lea.sflag [#allocation4], %s1854_s17  ;;  %s1202_s10 = sshra.s32 %s947_s13, 4  ;;  %s1203_s10 = int_to_ptr.hbm [resolvable:$true] %s1202_s10 }
 0x42b   : > { %s1204_s1 = scalar_lea.hbm %s1203_s10, 8  ;;  %s1208_s3 = scalar_lea.hbm %s1814_s7, 16 }
 0x42c   : > { %p1205_p5 = scmp.ne.s32.totalorder %s1203_s10, %s1204_s1  ;;  %p1209_p8 = scmp.lt.s32.totalorder %s1203_s10, %s1814_s7 }
 0x42d   : > { %p1210_p10 = scmp.lt.s32.totalorder %s1208_s3, %s1204_s1 }
 0x42e   : > { %p1206_p6 = pnand %p1205_p5, %p1389_p3 }
 0x42f   : > { %p1211_p11 = por %p1210_p10, %p1209_p8 }
 0x430   : > { %p1207_p7 = pneg %p1206_p6 }
 0x432   : > { %p1212_p12 = pnand %p1211_p11, %p1207_p7 }
 0x434   : > { %1215 = shalt.err (!%p1212_p12)
}
 0x435   : > { %1077 = dma.vmem_to_hbm [thread:$0]  (%p1389_p3), %s945_s27, 128, %s947_s13, %s931_s18  }
 0x436 PF: > { %p1089_p13 = scmp.ge.s32.totalorder %s1286_s8, 2  ;;  %s958_s23 = sand.u32 1, %s1258_s24  }
 0x437   : > { %s959_s0 = scalar_lea.sflag [#allocation4], %s958_s23 }
 0x438   : > { %p1084_p0 = pnand %p1089_p13, %p1399_p9 }
 0x43a   : > { %p1085_p1 = pneg %p1084_p0 }
 0x43c   : > { %1253 = dma.done.wait (%p1085_p1), %s959_s0, 128  }
 0x43d   : > { %1255 = vsyncadd (%p1085_p1), %s959_s0, 4294967168  ;;  %s21_s8 = sadd.s32 1, %s1286_s8   ;;  %s1855_s24 = smov %s1262_s25 }
 0x43e   : > { %p18_p2 = scmp.ge.s32.totalorder %s21_s8, 6   ;;  %s1856_s25 = smov %s1266_s26 }
 0x43f   : > { %s1857_s26 = smov %s1409_s20  ;;  %s1858_s27 = smov %s1278_s29 }
 0x440   : > { %s1859_s28 = smov %s1282_s30  ;;  %s1860_s29 = smov %s1863_s11 }
 0x441   : > { %s1861_s30 = smov %s1867_s12  ;;  %20 = sbr.rel (!%p18_p2) target bundleno = 11 (0xb), region = 107 }
 0x446   :  { %965 = vsyncpa [#allocation4], 1 }
 0x447   :  { %967 = vsyncpa [#allocation4 + $0x1], 1 }
 0x448   :  { %968 = vsyncpa [#allocation5], 1 }
 0x449   :  { %970 = vsyncpa [#allocation5 + $0x1], 1 }

</bundles_post_ra>
